<compile_context>
chip_gen: v5e
topology: v5e:2x2
jax: 0.10.0
libtpu: 0.0.40
codegen_flags: <defaults>
</compile_context>

<pallas_src>
import functools

import jax
import jax.numpy as jnp
from jax.experimental import pallas as pl
from jax.experimental.pallas import tpu as pltpu


def _l1_plus_jsd_kernel(pred_ref, tgt_ref, out_ref, *, m_total, tile_m):
    """Per-row-tile partial sums of the L1 and JSD terms.

    pred_ref: (3, tile_m, C) VMEM block -- rows [i*tile_m, i*tile_m + tile_m)
              of the clean / aug1 / aug2 chunks.
    tgt_ref : (tile_m, C) VMEM block    -- same rows of the clean-chunk target.
    out_ref : (8, 128) VMEM block       -- [0, 0] = sum |pred_orig - target|,
                                           [0, 1] = sum_k KL_k  (un-normalized).
    """
    i = pl.program_id(0)
    row_ids = i * tile_m + jax.lax.broadcasted_iota(jnp.int32, (tile_m, 1), 0)
    valid = row_ids < m_total                       # (tile_m, 1) ragged-tail mask

    # ---- L1 partial: sum over valid rows of |pred_orig - target| ----
    po = jnp.where(valid, pred_ref[0].astype(jnp.float32), 0.0)
    tg = jnp.where(valid, tgt_ref[...].astype(jnp.float32), 0.0)
    l1_partial = jnp.sum(jnp.abs(po - tg))

    # ---- JSD partial (AugMix-style), log-softmax form ----
    def stream(x_raw):
        x = jnp.where(valid, x_raw.astype(jnp.float32), 0.0)
        s = x - jnp.max(x, axis=1, keepdims=True)
        e = jnp.exp(s)
        z = jnp.sum(e, axis=1, keepdims=True)
        logp = s - jnp.log(z)                       # exact log-softmax (finite)
        p = jnp.where(valid, e * pl.reciprocal(z, approx=True), 0.0)
        return p, jnp.sum(p * logp)                 # sum p * log p

    p_sum, ent_total = stream(pred_ref[0])
    p, ent = stream(pred_ref[1])
    p_sum, ent_total = p_sum + p, ent_total + ent
    p, ent = stream(pred_ref[2])
    p_sum, ent_total = p_sum + p, ent_total + ent

    # sum_k KL(p_k || p_mix) = sum_k sum(p_k log p_k) - sum((p_c+p_1+p_2)*log p_mix)
    log_mix = jnp.log(jnp.clip(p_sum * jnp.float32(1.0 / 3.0), 1e-7, 1.0))
    jsd_partial = ent_total - jnp.sum(p_sum * log_mix)   # invalid rows contribute 0

    # ---- lane-dense partial-sum output block ----
    r = jax.lax.broadcasted_iota(jnp.int32, (8, 128), 0)
    l = jax.lax.broadcasted_iota(jnp.int32, (8, 128), 1)
    out_ref[...] = jnp.where(
        (r == 0) & (l == 0), l1_partial,
        jnp.where((r == 0) & (l == 1), jsd_partial, 0.0))


def l1_loss_plus(pred, target, *, loss_weight=1.0, lambda_weight=1e-4, tile_m=None):
    """Forward of L1LossPlus (reduction='mean', additional_loss='jsd', weight=None)."""
    n, c = pred.shape
    assert n % 3 == 0, "leading dim must stack [orig; aug1; aug2]"
    m = n // 3

    # Free (metadata-only) reshapes -- no HBM slice copies in the wrapper.
    pred3 = pred.reshape(3, m, c)
    tgt3 = target.reshape(3, m, c)

    if tile_m is None:
        # Keep (3+1) streams x 2 pipeline buffers x tile bytes comfortably inside
        # scoped VMEM on every generation (v5e 16 MiB default, v7x 64 MiB phys).
        row_bytes = c * max(pred.dtype.itemsize, 4)
        tile_m = (512 * 1024) // row_bytes
        tile_m = max(8, (tile_m // 8) * 8)
    tile_m = min(int(tile_m), m)
    if tile_m < m:
        tile_m = max(8, (tile_m // 8) * 8)          # sublane (8) constraint when tiling
    num_tiles = pl.cdiv(m, tile_m)

    kernel = functools.partial(_l1_plus_jsd_kernel, m_total=m, tile_m=tile_m)

    partials = pl.pallas_call(
        kernel,
        out_shape=jax.ShapeDtypeStruct((num_tiles * 8, 128), jnp.float32),
        grid=(num_tiles,),
        in_specs=[
            # All three chunks for the same row window, one strided block.
            pl.BlockSpec((3, tile_m, c), lambda i: (0, i, 0)),
            # Target: clean chunk only (leading dim squeezed out).
            pl.BlockSpec((None, tile_m, c), lambda i: (0, i, 0)),
        ],
        out_specs=pl.BlockSpec((8, 128), lambda i: (i, 0)),
        compiler_params=pltpu.CompilerParams(
            dimension_semantics=("parallel",)),
    )(pred3, tgt3)

    # Tiny final reduce + global scalings (applied once, not per tile).
    l1_sum = jnp.sum(partials[0::8, 0])
    jsd_sum = jnp.sum(partials[0::8, 1])
    loss_bbox = loss_weight * l1_sum / jnp.float32(m * c)
    return loss_bbox + lambda_weight * (jsd_sum / 3.0)


def _reference(pred, target, *, loss_weight=1.0, lambda_weight=1e-4):
    """Pure-JAX reference mirroring the PyTorch module."""
    n = pred.shape[0]
    m = n // 3
    po, pa1, pa2 = pred[:m], pred[m:2 * m], pred[2 * m:]
    tgt = target[:m]
    loss_bbox = loss_weight * jnp.mean(jnp.abs(po - tgt))
    logps = [jax.nn.log_softmax(x.astype(jnp.float32), axis=1) for x in (po, pa1, pa2)]
    ps = [jnp.exp(lp) for lp in logps]
    p_mix = jnp.clip((ps[0] + ps[1] + ps[2]) / 3.0, 1e-7, 1.0)
    log_mix = jnp.log(p_mix)
    kl = lambda p, lp: jnp.sum(p * (lp - log_mix))
    jsd = (kl(ps[0], logps[0]) + kl(ps[1], logps[1]) + kl(ps[2], logps[2])) / 3.0
    return loss_bbox + lambda_weight * jsd


if __name__ == "__main__":
    key = jax.random.PRNGKey(0)
    k1, k2 = jax.random.split(key)
    # N = 3 * M rows stacked [orig; aug1; aug2]; C box/class dims.
    # M=40 with tile_m=16 exercises the tiled grid (3 tiles) and the masked tail.
    M, C = 40, 32
    N = 3 * M
    pred = jax.random.normal(k1, (N, C), dtype=jnp.float32)
    target = jax.random.normal(k2, (N, C), dtype=jnp.float32)

    loss = l1_loss_plus(pred, target, loss_weight=1.0, lambda_weight=1e-4, tile_m=16)
    loss = jax.block_until_ready(loss)

    ref = _reference(pred, target, loss_weight=1.0, lambda_weight=1e-4)
    assert jnp.allclose(loss, ref, rtol=1e-4, atol=1e-5), (loss, ref)

    print("KERNEL_OK")
</pallas_src>

<mosaic_0001>
module attributes {stable_mosaic.version = 11 : i64} {
  func.func @_l1_plus_jsd_kernel(%arg0: i32, %arg1: memref<3x16x32xf32, #tpu.memory_space<vmem>>, %arg2: memref<1x16x32xf32, #tpu.memory_space<vmem>>, %arg3: memref<8x128xf32, #tpu.memory_space<vmem>>) attributes {dimension_semantics = [#tpu.dimension_semantics<parallel>], iteration_bounds = array<i64: 3>, scalar_prefetch = 0 : i64, scratch_operands = 0 : i64, tpu.core_type = #tpu.core_type<tc>, window_params = [{transform_indices = @transform_0, window_bounds = array<i64: 3, 16, 32>}, {transform_indices = @transform_1, window_bounds = array<i64: 1, 16, 32>}, {transform_indices = @transform_2, window_bounds = array<i64: 8, 128>}]} {
    %c16_i32 = arith.constant 16 : i32
    %0 = arith.muli %arg0, %c16_i32 : i32
    %1 = tpu.iota {dimensions = array<i32: 0>} : vector<16x1xi32>
    %2 = vector.broadcast %0 : i32 to vector<16x1xi32>
    %3 = arith.addi %2, %1 : vector<16x1xi32>
    %c40_i32 = arith.constant 40 : i32
    %4 = vector.broadcast %c40_i32 : i32 to vector<16x1xi32>
    %5 = arith.cmpi slt, %3, %4 : vector<16x1xi32>
    %c0 = arith.constant 0 : index
    %c0_0 = arith.constant 0 : index
    %c0_1 = arith.constant 0 : index
    %6 = vector.load %arg1[%c0, %c0_0, %c0_1] : memref<3x16x32xf32, #tpu.memory_space<vmem>>, vector<1x16x32xf32>
    %7 = vector.shape_cast %6 : vector<1x16x32xf32> to vector<16x32xf32>
    %cst = arith.constant 0.000000e+00 : f32
    %8 = vector.shape_cast %5 : vector<16x1xi1> to vector<16x1xi1>
    %9 = vector.broadcast %8 : vector<16x1xi1> to vector<16x32xi1>
    %10 = vector.broadcast %cst : f32 to vector<16x32xf32>
    %11 = arith.select %9, %7, %10 : vector<16x32xi1>, vector<16x32xf32>
    %c0_2 = arith.constant 0 : index
    %c0_3 = arith.constant 0 : index
    %c0_4 = arith.constant 0 : index
    %12 = vector.load %arg2[%c0_2, %c0_3, %c0_4] : memref<1x16x32xf32, #tpu.memory_space<vmem>>, vector<1x16x32xf32>
    %13 = vector.shape_cast %12 : vector<1x16x32xf32> to vector<16x32xf32>
    %cst_5 = arith.constant 0.000000e+00 : f32
    %14 = vector.shape_cast %5 : vector<16x1xi1> to vector<16x1xi1>
    %15 = vector.broadcast %14 : vector<16x1xi1> to vector<16x32xi1>
    %16 = vector.broadcast %cst_5 : f32 to vector<16x32xf32>
    %17 = arith.select %15, %13, %16 : vector<16x32xi1>, vector<16x32xf32>
    %18 = arith.subf %11, %17 : vector<16x32xf32>
    %19 = math.absf %18 : vector<16x32xf32>
    %20 = vector.shape_cast %19 : vector<16x32xf32> to vector<1x16x32xf32>
    %cst_6 = arith.constant dense<0.000000e+00> : vector<1xf32>
    %21 = vector.multi_reduction <add>, %20, %cst_6 [1, 2] : vector<1x16x32xf32> to vector<1xf32>
    %22 = vector.shape_cast %21 : vector<1xf32> to vector<1x1x1xf32>
    %23 = vector.extract %22[0, 0, 0] : f32 from vector<1x1x1xf32>
    %c0_7 = arith.constant 0 : index
    %c0_8 = arith.constant 0 : index
    %c0_9 = arith.constant 0 : index
    %24 = vector.load %arg1[%c0_7, %c0_8, %c0_9] : memref<3x16x32xf32, #tpu.memory_space<vmem>>, vector<1x16x32xf32>
    %25 = vector.shape_cast %24 : vector<1x16x32xf32> to vector<16x32xf32>
    %cst_10 = arith.constant 0.000000e+00 : f32
    %26 = vector.shape_cast %5 : vector<16x1xi1> to vector<16x1xi1>
    %27 = vector.broadcast %26 : vector<16x1xi1> to vector<16x32xi1>
    %28 = vector.broadcast %cst_10 : f32 to vector<16x32xf32>
    %29 = arith.select %27, %25, %28 : vector<16x32xi1>, vector<16x32xf32>
    %cst_11 = arith.constant dense<0xFF800000> : vector<16xf32>
    %30 = vector.multi_reduction <maximumf>, %29, %cst_11 [1] : vector<16x32xf32> to vector<16xf32>
    %31 = vector.shape_cast %30 : vector<16xf32> to vector<16x1xf32>
    %32 = vector.broadcast %31 : vector<16x1xf32> to vector<16x32xf32>
    %33 = arith.subf %29, %32 : vector<16x32xf32>
    %34 = math.exp %33 : vector<16x32xf32>
    %cst_12 = arith.constant dense<0.000000e+00> : vector<16xf32>
    %35 = vector.multi_reduction <add>, %34, %cst_12 [1] : vector<16x32xf32> to vector<16xf32>
    %36 = vector.shape_cast %35 : vector<16xf32> to vector<16x1xf32>
    %37 = math.log %36 : vector<16x1xf32>
    %38 = vector.broadcast %37 : vector<16x1xf32> to vector<16x32xf32>
    %39 = arith.subf %33, %38 : vector<16x32xf32>
    %40 = tpu.reciprocal %36 {approx = true} : vector<16x1xf32> -> vector<16x1xf32>
    %41 = vector.broadcast %40 : vector<16x1xf32> to vector<16x32xf32>
    %42 = arith.mulf %34, %41 : vector<16x32xf32>
    %cst_13 = arith.constant 0.000000e+00 : f32
    %43 = vector.shape_cast %5 : vector<16x1xi1> to vector<16x1xi1>
    %44 = vector.broadcast %43 : vector<16x1xi1> to vector<16x32xi1>
    %45 = vector.broadcast %cst_13 : f32 to vector<16x32xf32>
    %46 = arith.select %44, %42, %45 : vector<16x32xi1>, vector<16x32xf32>
    %47 = arith.mulf %46, %39 : vector<16x32xf32>
    %48 = vector.shape_cast %47 : vector<16x32xf32> to vector<1x16x32xf32>
    %cst_14 = arith.constant dense<0.000000e+00> : vector<1xf32>
    %49 = vector.multi_reduction <add>, %48, %cst_14 [1, 2] : vector<1x16x32xf32> to vector<1xf32>
    %50 = vector.shape_cast %49 : vector<1xf32> to vector<1x1x1xf32>
    %51 = vector.extract %50[0, 0, 0] : f32 from vector<1x1x1xf32>
    %c1 = arith.constant 1 : index
    %c0_15 = arith.constant 0 : index
    %c0_16 = arith.constant 0 : index
    %52 = vector.load %arg1[%c1, %c0_15, %c0_16] : memref<3x16x32xf32, #tpu.memory_space<vmem>>, vector<1x16x32xf32>
    %53 = vector.shape_cast %52 : vector<1x16x32xf32> to vector<16x32xf32>
    %cst_17 = arith.constant 0.000000e+00 : f32
    %54 = vector.shape_cast %5 : vector<16x1xi1> to vector<16x1xi1>
    %55 = vector.broadcast %54 : vector<16x1xi1> to vector<16x32xi1>
    %56 = vector.broadcast %cst_17 : f32 to vector<16x32xf32>
    %57 = arith.select %55, %53, %56 : vector<16x32xi1>, vector<16x32xf32>
    %cst_18 = arith.constant dense<0xFF800000> : vector<16xf32>
    %58 = vector.multi_reduction <maximumf>, %57, %cst_18 [1] : vector<16x32xf32> to vector<16xf32>
    %59 = vector.shape_cast %58 : vector<16xf32> to vector<16x1xf32>
    %60 = vector.broadcast %59 : vector<16x1xf32> to vector<16x32xf32>
    %61 = arith.subf %57, %60 : vector<16x32xf32>
    %62 = math.exp %61 : vector<16x32xf32>
    %cst_19 = arith.constant dense<0.000000e+00> : vector<16xf32>
    %63 = vector.multi_reduction <add>, %62, %cst_19 [1] : vector<16x32xf32> to vector<16xf32>
    %64 = vector.shape_cast %63 : vector<16xf32> to vector<16x1xf32>
    %65 = math.log %64 : vector<16x1xf32>
    %66 = vector.broadcast %65 : vector<16x1xf32> to vector<16x32xf32>
    %67 = arith.subf %61, %66 : vector<16x32xf32>
    %68 = tpu.reciprocal %64 {approx = true} : vector<16x1xf32> -> vector<16x1xf32>
    %69 = vector.broadcast %68 : vector<16x1xf32> to vector<16x32xf32>
    %70 = arith.mulf %62, %69 : vector<16x32xf32>
    %cst_20 = arith.constant 0.000000e+00 : f32
    %71 = vector.shape_cast %5 : vector<16x1xi1> to vector<16x1xi1>
    %72 = vector.broadcast %71 : vector<16x1xi1> to vector<16x32xi1>
    %73 = vector.broadcast %cst_20 : f32 to vector<16x32xf32>
    %74 = arith.select %72, %70, %73 : vector<16x32xi1>, vector<16x32xf32>
    %75 = arith.mulf %74, %67 : vector<16x32xf32>
    %76 = vector.shape_cast %75 : vector<16x32xf32> to vector<1x16x32xf32>
    %cst_21 = arith.constant dense<0.000000e+00> : vector<1xf32>
    %77 = vector.multi_reduction <add>, %76, %cst_21 [1, 2] : vector<1x16x32xf32> to vector<1xf32>
    %78 = vector.shape_cast %77 : vector<1xf32> to vector<1x1x1xf32>
    %79 = vector.extract %78[0, 0, 0] : f32 from vector<1x1x1xf32>
    %80 = arith.addf %46, %74 : vector<16x32xf32>
    %81 = arith.addf %51, %79 : f32
    %c2 = arith.constant 2 : index
    %c0_22 = arith.constant 0 : index
    %c0_23 = arith.constant 0 : index
    %82 = vector.load %arg1[%c2, %c0_22, %c0_23] : memref<3x16x32xf32, #tpu.memory_space<vmem>>, vector<1x16x32xf32>
    %83 = vector.shape_cast %82 : vector<1x16x32xf32> to vector<16x32xf32>
    %cst_24 = arith.constant 0.000000e+00 : f32
    %84 = vector.shape_cast %5 : vector<16x1xi1> to vector<16x1xi1>
    %85 = vector.broadcast %84 : vector<16x1xi1> to vector<16x32xi1>
    %86 = vector.broadcast %cst_24 : f32 to vector<16x32xf32>
    %87 = arith.select %85, %83, %86 : vector<16x32xi1>, vector<16x32xf32>
    %cst_25 = arith.constant dense<0xFF800000> : vector<16xf32>
    %88 = vector.multi_reduction <maximumf>, %87, %cst_25 [1] : vector<16x32xf32> to vector<16xf32>
    %89 = vector.shape_cast %88 : vector<16xf32> to vector<16x1xf32>
    %90 = vector.broadcast %89 : vector<16x1xf32> to vector<16x32xf32>
    %91 = arith.subf %87, %90 : vector<16x32xf32>
    %92 = math.exp %91 : vector<16x32xf32>
    %cst_26 = arith.constant dense<0.000000e+00> : vector<16xf32>
    %93 = vector.multi_reduction <add>, %92, %cst_26 [1] : vector<16x32xf32> to vector<16xf32>
    %94 = vector.shape_cast %93 : vector<16xf32> to vector<16x1xf32>
    %95 = math.log %94 : vector<16x1xf32>
    %96 = vector.broadcast %95 : vector<16x1xf32> to vector<16x32xf32>
    %97 = arith.subf %91, %96 : vector<16x32xf32>
    %98 = tpu.reciprocal %94 {approx = true} : vector<16x1xf32> -> vector<16x1xf32>
    %99 = vector.broadcast %98 : vector<16x1xf32> to vector<16x32xf32>
    %100 = arith.mulf %92, %99 : vector<16x32xf32>
    %cst_27 = arith.constant 0.000000e+00 : f32
    %101 = vector.shape_cast %5 : vector<16x1xi1> to vector<16x1xi1>
    %102 = vector.broadcast %101 : vector<16x1xi1> to vector<16x32xi1>
    %103 = vector.broadcast %cst_27 : f32 to vector<16x32xf32>
    %104 = arith.select %102, %100, %103 : vector<16x32xi1>, vector<16x32xf32>
    %105 = arith.mulf %104, %97 : vector<16x32xf32>
    %106 = vector.shape_cast %105 : vector<16x32xf32> to vector<1x16x32xf32>
    %cst_28 = arith.constant dense<0.000000e+00> : vector<1xf32>
    %107 = vector.multi_reduction <add>, %106, %cst_28 [1, 2] : vector<1x16x32xf32> to vector<1xf32>
    %108 = vector.shape_cast %107 : vector<1xf32> to vector<1x1x1xf32>
    %109 = vector.extract %108[0, 0, 0] : f32 from vector<1x1x1xf32>
    %110 = arith.addf %80, %104 : vector<16x32xf32>
    %111 = arith.addf %81, %109 : f32
    %cst_29 = arith.constant 0.333333343 : f32
    %112 = vector.broadcast %cst_29 : f32 to vector<16x32xf32>
    %113 = arith.mulf %110, %112 : vector<16x32xf32>
    %cst_30 = arith.constant 1.000000e-07 : f32
    %cst_31 = arith.constant 1.000000e+00 : f32
    %114 = vector.broadcast %cst_30 : f32 to vector<16x32xf32>
    %115 = arith.maximumf %114, %113 : vector<16x32xf32>
    %116 = vector.broadcast %cst_31 : f32 to vector<16x32xf32>
    %117 = arith.minimumf %116, %115 : vector<16x32xf32>
    %118 = math.log %117 : vector<16x32xf32>
    %119 = arith.mulf %110, %118 : vector<16x32xf32>
    %120 = vector.shape_cast %119 : vector<16x32xf32> to vector<1x16x32xf32>
    %cst_32 = arith.constant dense<0.000000e+00> : vector<1xf32>
    %121 = vector.multi_reduction <add>, %120, %cst_32 [1, 2] : vector<1x16x32xf32> to vector<1xf32>
    %122 = vector.shape_cast %121 : vector<1xf32> to vector<1x1x1xf32>
    %123 = vector.extract %122[0, 0, 0] : f32 from vector<1x1x1xf32>
    %124 = arith.subf %111, %123 : f32
    %125 = tpu.iota {dimensions = array<i32: 0>} : vector<8x128xi32>
    %126 = tpu.iota {dimensions = array<i32: 1>} : vector<8x128xi32>
    %c0_i32 = arith.constant 0 : i32
    %127 = vector.broadcast %c0_i32 : i32 to vector<8x128xi32>
    %128 = arith.cmpi eq, %125, %127 : vector<8x128xi32>
    %c0_i32_33 = arith.constant 0 : i32
    %129 = vector.broadcast %c0_i32_33 : i32 to vector<8x128xi32>
    %130 = arith.cmpi eq, %126, %129 : vector<8x128xi32>
    %131 = arith.andi %128, %130 : vector<8x128xi1>
    %c0_i32_34 = arith.constant 0 : i32
    %132 = vector.broadcast %c0_i32_34 : i32 to vector<8x128xi32>
    %133 = arith.cmpi eq, %125, %132 : vector<8x128xi32>
    %c1_i32 = arith.constant 1 : i32
    %134 = vector.broadcast %c1_i32 : i32 to vector<8x128xi32>
    %135 = arith.cmpi eq, %126, %134 : vector<8x128xi32>
    %136 = arith.andi %133, %135 : vector<8x128xi1>
    %cst_35 = arith.constant 0.000000e+00 : f32
    %137 = vector.broadcast %124 : f32 to vector<8x128xf32>
    %138 = vector.broadcast %cst_35 : f32 to vector<8x128xf32>
    %139 = arith.select %136, %137, %138 : vector<8x128xi1>, vector<8x128xf32>
    %140 = vector.broadcast %23 : f32 to vector<8x128xf32>
    %141 = arith.select %131, %140, %139 : vector<8x128xi1>, vector<8x128xf32>
    %c0_36 = arith.constant 0 : index
    %c0_37 = arith.constant 0 : index
    %142 = vector.load %arg3[%c0_36, %c0_37] : memref<8x128xf32, #tpu.memory_space<vmem>>, vector<8x128xf32>
    tpu.vector_store %arg3[%c0_36, %c0_37], %141 {strides = array<i32>} : memref<8x128xf32, #tpu.memory_space<vmem>>, vector<8x128xf32>,
    return
  }
  func.func @transform_0(%arg0: i32) -> (i32, i32, i32) {
    %c0_i32 = arith.constant 0 : i32
    %c0_i32_0 = arith.constant 0 : i32
    %c0_i32_1 = arith.constant 0 : i32
    return %c0_i32, %arg0, %c0_i32_0 : i32, i32, i32
  }
  func.func @transform_1(%arg0: i32) -> (i32, i32, i32) {
    %c0_i32 = arith.constant 0 : i32
    %c0_i32_0 = arith.constant 0 : i32
    %c0_i32_1 = arith.constant 0 : i32
    return %c0_i32, %arg0, %c0_i32_0 : i32, i32, i32
  }
  func.func @transform_2(%arg0: i32) -> (i32, i32) {
    %c0_i32 = arith.constant 0 : i32
    %c0_i32_0 = arith.constant 0 : i32
    return %arg0, %c0_i32 : i32, i32
  }
}

</mosaic_0001>

<bundles_post_ra>
// kernel: tpu_custom_call.1
= control target key start
LH: loop header
LB: loop body
LE: loop exit
PB: predicated region body
PF: predicated region fallthrough
CT: control target
= control target key end

     0   :  { %7 = vsyncpa [#allocation4], 0  ;;  %s1290_s0 = inlined_call_operand.vmem [shape: f32[3,40,32], index: 0, kind: input, shape index: {}]   ;;  %s1291_s1 = inlined_call_operand.vmem [shape: f32[3,40,32], index: 1, kind: input, shape index: {}]   ;;  %s1292_s2 = inlined_call_operand.hbm [shape: f32[24,128], index: 2, kind: output, shape index: {}]  }
   0x1   :  { %9 = vsyncpa [#allocation4 + $0x1], 0  ;;  %s1021_s9 = smov 0   ;;  %s1023_s10 = smov 0  }
   0x2   :  { %s1025_s11 = smov 0   ;;  %s1027_s12 = smov 0  }
   0x3 LB: > { %s1042_s13 = sadd.s32 4294967295, %s972_s12   ;;  %s691_s14 = sadd.s32 4294967294, %s972_s12   ;;  %s972_s12 = sphi %s1027_s12, %s1302_s12   ;;  %s968_s11 = sphi %s1025_s11, %s1301_s11   ;;  %s964_s10 = sphi %s1023_s10, %s1300_s10   ;;  %s960_s9 = sphi %s1021_s9, %s1299_s9  }
   0x4   : > { %s1046_s15 = sadd.s32 1, %s972_s12   ;;  %s22_s16 = sadd.s32 1, %s968_s11 }
   0x5   : > { %s19_s17 = ssub.s32 %s972_s12, %s1046_s15  ;;  %p29_p0 = scmp.ne.s32.totalorder %s968_s11, %s964_s10 }
   0x6   : > { %p20_p1 = scmp.eq.s32.totalorder %s19_s17, 0  ;;  %p30_p2 = scmp.eq.s32.totalorder %s972_s12, 0 }
   0x7   : > { %p85_p3 = scmp.eq.s32.totalorder %s1042_s13, 2  ;;  %p90_p4 = scmp.ne.s32.totalorder %s964_s10, %s960_s9 }
   0x8   : > { %s1058_s18 = scalar_select %p20_p1, %s968_s11, %s22_s16  }
   0x9   : > { %p31_p5 = por %p30_p2, %p29_p0  ;;  %p1060_p6 = por %p85_p3, %p29_p0 }
   0xa   : > { %p91_p7 = scmp.eq.s32.totalorder %s691_s14, 2  ;;  %p693_p9 = scmp.ge.s32.totalorder %s972_s12, 3 }
   0xc   : > { %p1064_p8 = por %p91_p7, %p90_p4  ;;  %107 = sbr.rel (%p693_p9) target bundleno = 62 (0x3e), region = 16 }
  0x11   : > { %110 = sbr.rel (!%p31_p5) target bundleno = 62 (0x3e), region = 20  ;;  %s112_s21 = sand.u32 (%p31_p5), 1, %s968_s11  }
  0x12   : > { %s694_s22 = sshll.u32 (%p31_p5), %s972_s12, 1  ;;  %s723_s23 = smul.u32 (%p31_p5), 48, %s112_s21 }
  0x13   : > { %s116_s24 = ssub.s32 (%p31_p5), 5, %s694_s22  ;;  %s720_s25 = sshll.u32 (%p31_p5), %s972_s12, 4 }
  0x14   : > { %p117_p10 = scmp.lt.s32.totalorder (%p31_p5), %s116_s24, 2  ;;  %s1075_s28 = scalar_lea.vmem (%p31_p5), %s1290_s0, %s720_s25  }
  0x15   : > { %s1080_s30 = scalar_lea.vmem (%p31_p5), [#allocation2], %s723_s23  }
  0x16   : > { %s1304_s24 = smov (!%p117_p10, %s116_s24), 2 }
  0x17   : > { %s119_s29 = smul.u32 24, %s1304_s24 }
  0x19   : > { %p697_p11 = scmp.eq.s32.totalorder %s119_s29, 0 }
  0x1a   : > { %s1083_s3 = sshrl.u32 (!%p697_p11), %s1304_s24, 1 }
  0x1b   : > { %125 = sbr.rel (%p697_p11) target bundleno = 62 (0x3e), region = 24  ;;  %p698_p12 = scmp.le.s32.totalorder (!%p697_p11), %s1083_s3, 0 }
  0x20   : > { %641 = sbr.rel (%p698_p12) target bundleno = 45 (0x2d), region = 127  ;;  %s1295_s4 = smov (!%p698_p12), %s1080_s30 }
  0x21   : > { %s1296_s5 = smov (!%p698_p12), %s1075_s28  ;;  %s1092_s6 = smov (!%p698_p12), 0  }
  0x22   : > { %s1094_s7 = smov (!%p698_p12), 0  }
  0x25 LB: >> { %v202_v0 = vld [vmem:[%s980_s5] sm:$0xff]  ;;  %v204_v1 = vld [vmem:[%s980_s5 + $0x8] sm:$0xff]  ;;  %s214_s8 = sadd.s32 1, %s984_s6  ;;  %v208_v3 = vld [vmem:[%s980_s5 + $0x30] sm:$0xff]  ;;  %s196_s7 = sadd.s32 1, %s988_s7   ;;  %s988_s7 = sphi %s1094_s7, %s196_s7   ;;  %s984_s6 = sphi %s1092_s6, %s1297_s6   ;;  %s980_s5 = sphi %s1296_s5, %s219_s5   ;;  %s976_s4 = sphi %s1295_s4, %s220_s4  }
  0x26   : >> { %v206_v2 = vld [vmem:[%s980_s5 + $0x28] sm:$0xff]  ;;  %203 = vst [vmem:[%s976_s4] sm:$0xff] %v202_v0  ;;  %p215_p13 = scmp.ge.s32.totalorder %s214_s8, %s1083_s3  ;;  %v210_v4 = vld [vmem:[%s980_s5 + $0x50] sm:$0xff]  ;;  %v212_v5 = vld [vmem:[%s980_s5 + $0x58] sm:$0xff]  ;;  %p195_p0 = scmp.ge.s32.totalorder %s196_s7, %s1083_s3 }
  0x27   : >> { %205 = vst [vmem:[%s976_s4 + $0x8] sm:$0xff] %v204_v1 }
  0x28   : >> { %207 = vst [vmem:[%s976_s4 + $0x10] sm:$0xff] %v206_v2  ;;  %s1306_s8 = smov (%p215_p13, %s214_s8), 0  ;;  %198 = sbr.rel (!%p195_p0) target bundleno = 37 (0x25), region = 133 }
  0x29   : >> { %209 = vst [vmem:[%s976_s4 + $0x18] sm:$0xff] %v208_v3  ;;  %s699_s14 = sshll.u32 %s1306_s8, 4  ;;  %s1297_s6 = smov %s1306_s8 }
  0x2a   : >> { %211 = vst [vmem:[%s976_s4 + $0x20] sm:$0xff] %v210_v4  ;;  %s219_s5 = scalar_lea.vmem %s1075_s28, %s699_s14  }
  0x2b   : >> { %213 = vst [vmem:[%s976_s4 + $0x28] sm:$0xff] %v212_v5  ;;  %s220_s4 = scalar_lea.vmem %s1080_s30, %s699_s14 [#allocation2]  }
  0x2d PF: > { %s1113_s16 = sand.u32 1, %s1304_s24   ;;  %s721_s17 = sshll.u32 %s1083_s3, 4 }
  0x2e   : > { %s1117_s21 = scalar_lea.vmem %s1075_s28, %s721_s17   ;;  %s1120_s22 = scalar_lea.vmem %s1080_s30, %s721_s17 [#allocation2]  }
  0x2f   : > { %p704_p1 = scmp.le.s32.totalorder %s1113_s16, 0 }
  0x30   : > { %s1298_s23 = smov (!%p704_p1), %s1120_s22  ;;  %s994_s25 = smov (!%p704_p1), %s1117_s21  }
  0x31   : > { %655 = sbr.rel (%p704_p1) target bundleno = 62 (0x3e), region = 138  ;;  %s998_s26 = smov (!%p704_p1), 0  }
  0x32   : > { %s1002_s27 = smov (!%p704_p1), 0  }
  0x36 LB: >> { %v237_v6 = vld [vmem:[%s996_s25] sm:$0xff]  ;;  %v239_v7 = vld [vmem:[%s996_s25 + $0x28] sm:$0xff]  ;;  %v241_v8 = vld [vmem:[%s996_s25 + $0x50] sm:$0xff]  ;;  %s243_s24 = sadd.s32 1, %s1000_s26  ;;  %s231_s27 = sadd.s32 1, %s1004_s27   ;;  %s1004_s27 = sphi %s1002_s27, %s231_s27   ;;  %s1000_s26 = sphi %s998_s26, %s999_s26   ;;  %s996_s25 = sphi %s994_s25, %s248_s25   ;;  %s992_s23 = sphi %s1298_s23, %s249_s23  }
  0x37   : >> { %238 = vst [vmem:[%s992_s23] sm:$0xff] %v237_v6  ;;  %p244_p2 = scmp.ge.s32.totalorder %s243_s24, %s1113_s16  ;;  %p230_p3 = scmp.ge.s32.totalorder %s231_s27, %s1113_s16 }
  0x38   : >> { %240 = vst [vmem:[%s992_s23 + $0x10] sm:$0xff] %v239_v7 }
  0x39   : >> { %242 = vst [vmem:[%s992_s23 + $0x20] sm:$0xff] %v241_v8  ;;  %s1308_s24 = smov (%p244_p2, %s243_s24), 0  ;;  %233 = sbr.rel (!%p230_p3) target bundleno = 54 (0x36), region = 144 }
  0x3a   : >> { %s705_s28 = sshll.u32 %s1308_s24, 3  ;;  %s999_s26 = smov %s1308_s24  }
  0x3b   : >> { %s248_s25 = scalar_lea.vmem %s1117_s21, %s705_s28   ;;  %s249_s23 = scalar_lea.vmem %s1120_s22, %s705_s28 [#allocation2]  }
  0x3e PF: > { %p707_p4 = scmp.ge.s32.totalorder %s972_s12, 1  ;;  %p271_p5 = scmp.lt.s32.totalorder %s972_s12, 4 }
  0x40   : > { %p272_p7 = pnand %p707_p4, %p271_p5 }
  0x41   : > { %s1137_s29 = sand.u32 (!%p272_p7), 1, %s964_s10   ;;  %s711_s30 = sshll.u32 (!%p272_p7), %s1042_s13, 4 }
  0x42   : > { %275 = sbr.rel (%p272_p7) target bundleno = 561 (0x231), region = 76  ;;  %s709_s5 = sshll.u32 (!%p272_p7), %s1042_s13, 1 }
  0x43   : > { %s724_s3 = smul.u32 (!%p272_p7), 48, %s1137_s29  ;;  %p318_p9 = scmp.lt.s32.totalorder (!%p272_p7), %s709_s5, 4 }
  0x44   : > { %s708_s22 = sshll.u32 (!%p272_p7), %s1137_s29, 3  ;;  %s717_s23 = sshll.u32 (!%p272_p7), %s1042_s13, 3 }
  0x45   : > { %s280_s4 = scalar_lea.vmem (!%p272_p7), [#allocation2], %s724_s3  ;;  %s561_s28 = scalar_lea.hbm (!%p272_p7), %s1292_s2, %s717_s23 }
  0x46   : > { %s565_s7 = sshll.u32 (!%p272_p7), %s561_s28, 4  ;;  %s551_s13 = scalar_lea.sflag (!%p272_p7), [#allocation4], %s1137_s29  ;;  %s566_s7 = int_to_ptr.hbm [resolvable:$true] %s565_s7 }
  0x47   : > { %v328_v9 = vlaneseq  ;;  %v331_v10 = vstv %s711_s30  ;;  %v714_v13 = vld [vmem:[%s280_s4 + $0x20] sm:$0xff]  ;;  %v712_v14 = vld [vmem:[%s280_s4 + $0x10] sm:$0xff]  ;;  %vm352_vm0 = vcmask 261120   ;;  %v715_v24 = vld [vmem:[%s280_s4 + $0x28] sm:$0xff]  ;;  %s1310_s5 = smov (!%p318_p9, %s709_s5), 4  ;;  %s892_s8 = sshra.s32 %s566_s7, 4  ;;  %s893_s8 = int_to_ptr.hbm [resolvable:$true] %s892_s8 }
  0x48   : > { %v336_v15 = vld [vmem:[%s280_s4] sm:$0xff]  ;;  %v713_v25 = vld [vmem:[%s280_s4 + $0x18] sm:$0xff]  ;;  %v337_v26 = vld [vmem:[%s280_s4 + $0x8] sm:$0xff]  ;;  %s710_s6 = sshll.u32 %s1310_s5, 3  ;;  %s307_s4 = scalar_lea.vmem [#allocation3], %s708_s22 }
  0x49   : > { %v1142_v11 = vshrl.u32 %v328_v9, 7  ;;  %s321_s14 = scalar_lea.vmem %s1291_s1, %s710_s6  ;;  %s563_s5 = sshll.u32 %s307_s4, 4  ;;  %s564_s5 = int_to_ptr.vmem [resolvable:$true] %s563_s5 }
  0x4a   : > { %v344_v63 = vld [vmem:[%s321_s14] sm:$0xff]  ;;  %v345_v2 = vld [vmem:[%s321_s14 + $0x8] sm:$0xff]  ;;  %s894_s14 = scalar_lea.hbm %s893_s8, 8  ;;  %s898_s22 = scalar_lea.hbm %s1292_s2, 24 }
  0x4b   : > { %v1145_v12 = vadd.s32 %v331_v10, %v1142_v11  ;;  %v330_v16 = vadd.s32 8, %v1142_v11  ;;  %vm540_vm3 = vcmp.eq.s32.totalorder %v1142_v11, 0  ;;  %p895_p10 = scmp.ne.s32.totalorder %s893_s8, %s894_s14  ;;  %p899_p13 = scmp.lt.s32.totalorder %s893_s8, %s1292_s2 }
  0x4c   : > { %p900_p0 = scmp.lt.s32.totalorder %s898_s22, %s894_s14 }
  0x4d   : > { %vm334_vm1 = vcmp.lt.s32.totalorder %v1145_v12, 40  ;;  %v1149_v17 = vadd.s32 %v331_v10, %v330_v16  ;;  %p896_p11 = pnand %p895_p10, %p1060_p6 }
  0x4e   : > { %v464_v18 = vsel %vm334_vm1, %v714_v13, 0.0  ;;  %v412_v19 = vsel %vm334_vm1, %v712_v14, 0.0  ;;  %v1157_v20 = vsel %vm334_vm1, %v336_v15, 0.0  ;;  %v346_v0 = vsel %vm334_vm1, %v344_v63, 0.0  ;;  %p901_p1 = por %p900_p0, %p899_p13 }
  0x4f   : > { %v466_v21 = vsel %vm352_vm0, %v464_v18, -inf  ;;  %v414_v22 = vsel %vm352_vm0, %v412_v19, -inf  ;;  %v365_v23 = vsel %vm352_vm0, %v1157_v20, -inf  ;;  %vm335_vm2 = vcmp.lt.s32.totalorder %v1149_v17, 40  ;;  %p897_p12 = pneg %p896_p11 }
  0x50   : > { %467 = vmax.xlane.f32.xlu2 %v466_v21  ;;  %415 = vmax.xlane.f32.xlu1 %v414_v22  ;;  %v465_v27 = vsel %vm335_vm2, %v715_v24, 0.0  ;;  %v413_v28 = vsel %vm335_vm2, %v713_v25, 0.0  ;;  %v343_v29 = vsel %vm335_vm2, %v337_v26, 0.0  ;;  %v348_v1 = vsub.f32 %v1157_v20, %v346_v0 }
  0x51   : > { %366 = vmax.xlane.f32.xlu0 %v365_v23  ;;  %v469_v30 = vsel %vm352_vm0, %v465_v27, -inf  ;;  %v417_v31 = vsel %vm352_vm0, %v413_v28, -inf  ;;  %v368_v32 = vsel %vm352_vm0, %v343_v29, -inf  ;;  %v347_v3 = vsel %vm335_vm2, %v345_v2, 0.0  ;;  %p902_p2 = pnand %p901_p1, %p897_p12 }
  0x52   : > { %v349_v4 = vsub.f32 %v343_v29, %v347_v3  ;;  %v350_v5 = vand.u32 2147483647, %v348_v1 }
  0x54   : > { %v351_v6 = vand.u32 2147483647, %v349_v4  ;;  %v353_v7 = vsel %vm352_vm0, %v350_v5, 0.0 }
  0x56   : > { %v354_v8 = vsel %vm352_vm0, %v351_v6, 0.0 }
  0x57   : > { %v355_v10 = vadd.f32 %v354_v8, %v353_v7 }
  0x58   : > { %470 = vmax.xlane.f32.xlu2 %v469_v30  ;;  %418 = vmax.xlane.f32.xlu1 %v417_v31 }
  0x59   : > { %369 = vmax.xlane.f32.xlu0 %v368_v32 }
  0xc3   : > { %v468_v33 = vpop.xlane.xlu2 %467  ;;  %v416_v34 = vpop.xlane.xlu1 %415 }
  0xc4   : > { %v1173_v35 = vsub.f32 %v412_v19, %v416_v34  ;;  %v367_v36 = vpop.xlane.xlu0 %366  ;;  %v1191_v51 = vsub.f32 %v464_v18, %v468_v33 }
  0xc5   : > { %v1176_v37 = vsub.f32 %v1157_v20, %v367_v36 }
  0xc6   : > { %v422_v38 = vmul.f32 1.442695, %v1173_v35  ;;  %v474_v54 = vmul.f32 1.442695, %v1191_v51 }
  0xc7   : > { %v373_v39 = vmul.f32 1.442695, %v1176_v37 }
  0xc8   : > { %838 = vpow2.f32 %v422_v38 }
  0xc9   : > { %840 = vpow2.f32 %v373_v39 }
  0xcb   : > { %v471_v40 = vpop.xlane.xlu2 %470  ;;  %v419_v41 = vpop.xlane.xlu1 %418 }
  0xcc   : > { %v1180_v42 = vsub.f32 %v465_v27, %v471_v40  ;;  %v1182_v43 = vsub.f32 %v413_v28, %v419_v41  ;;  %v370_v44 = vpop.xlane.xlu0 %369 }
  0xcd   : > { %v1184_v45 = vsub.f32 %v343_v29, %v370_v44 }
  0xce   : > { %v476_v46 = vmul.f32 1.442695, %v1180_v42  ;;  %v424_v47 = vmul.f32 1.442695, %v1182_v43  ;;  %v1188_v48 = vpop.eup %838 }
  0xcf   : > { %v375_v49 = vmul.f32 1.442695, %v1184_v45  ;;  %v841_v50 = vpop.eup %840  ;;  %v426_v52 = vsel %vm352_vm0, %v1188_v48, 0.0 }
  0xd0   : > { %842 = vpow2.f32 %v476_v46  ;;  %427 = vadd.xlane.f32.xlu2 %v426_v52  ;;  %v377_v53 = vsel %vm352_vm0, %v841_v50, 0.0 }
  0xd1   : > { %844 = vpow2.f32 %v424_v47  ;;  %378 = vadd.xlane.f32.xlu0 %v377_v53 }
  0xd2   : > { %846 = vpow2.f32 %v375_v49 }
  0xd3   : > { %848 = vpow2.f32 %v474_v54 }
  0xd6   : > { %v1197_v55 = vpop.eup %842 }
  0xd7   : > { %v1199_v56 = vpop.eup %844  ;;  %v481_v57 = vsel %vm352_vm0, %v1197_v55, 0.0 }
  0xd8   : > { %v1203_v58 = vpop.eup %846  ;;  %v429_v59 = vsel %vm352_vm0, %v1199_v56, 0.0  ;;  %482 = vadd.xlane.f32.xlu2 %v481_v57 }
  0xd9   : > { %v380_v60 = vsel %vm352_vm0, %v1203_v58, 0.0  ;;  %430 = vadd.xlane.f32.xlu0 %v429_v59  ;;  %v1209_v61 = vpop.eup %848 }
  0xda   : > { %381 = vadd.xlane.f32.xlu1 %v380_v60  ;;  %v478_v62 = vsel %vm352_vm0, %v1209_v61, 0.0 }
  0xe1   : > { %356 = vadd.xlane.f32.xlu0 %v355_v10 }
  0xe2   : > { %479 = vadd.xlane.f32.xlu1 %v478_v62 }
 0x143   : > { %v428_v13 = vpop.xlane.xlu2 %427 }
 0x144   : > { %v379_v14 = vpop.xlane.xlu0 %378  ;;  %850 = vlog2.f32 %v428_v13 }
 0x145   : > { %852 = vlog2.f32 %v379_v14 }
 0x146   : > { %854 = vrcp.f32 %v379_v14 }
 0x147   : > { %856 = vrcp.f32 %v428_v13 }
 0x14a   : > { %v851_v15 = vpop.eup %850 }
 0x14b   : > { %v483_v16 = vpop.xlane.xlu2 %482  ;;  %v853_v18 = vpop.eup %852  ;;  %v433_v25 = vmul.f32 0.6931472, %v851_v15 }
 0x14c   : > { %858 = vlog2.f32 %v483_v16  ;;  %v855_v20 = vpop.eup %854  ;;  %v431_v21 = vpop.xlane.xlu0 %430  ;;  %v384_v23 = vmul.f32 0.6931472, %v853_v18 }
 0x14d   : > { %v382_v19 = vpop.xlane.xlu1 %381  ;;  %860 = vrcp.f32 %v483_v16  ;;  %v857_v22 = vpop.eup %856  ;;  %v391_v24 = vmul.f32 %v855_v20, %v841_v50  ;;  %v436_v34 = vsub.f32 %v1173_v35, %v433_v25 }
 0x14e   : > { %862 = vlog2.f32 %v382_v19  ;;  %v440_v26 = vmul.f32 %v857_v22, %v1188_v48  ;;  %v387_v28 = vsub.f32 %v1176_v37, %v384_v23 }
 0x14f   : > { %864 = vrcp.f32 %v382_v19  ;;  %v393_v30 = vsel %vm334_vm1, %v391_v24, 0.0 }
 0x150   : > { %866 = vlog2.f32 %v431_v21  ;;  %v442_v38 = vsel %vm334_vm1, %v440_v26, 0.0  ;;  %v395_v37 = vmul.f32 %v393_v30, %v387_v28 }
 0x151   : > { %868 = vrcp.f32 %v431_v21  ;;  %v444_v53 = vmul.f32 %v442_v38, %v436_v34  ;;  %v458_v5 = vadd.f32 %v442_v38, %v393_v30 }
 0x152   : > { %v859_v27 = vpop.eup %858  ;;  %v397_v57 = vsel %vm352_vm0, %v395_v37, 0.0 }
 0x153   : > { %v861_v29 = vpop.eup %860  ;;  %v487_v40 = vmul.f32 0.6931472, %v859_v27  ;;  %v446_v0 = vsel %vm352_vm0, %v444_v53, 0.0 }
 0x154   : > { %v863_v31 = vpop.eup %862  ;;  %v493_v48 = vmul.f32 %v861_v29, %v1197_v55  ;;  %v357_v28 = vpop.xlane.xlu0 %356 }
 0x155   : > { %v480_v32 = vpop.xlane.xlu1 %479  ;;  %v865_v33 = vpop.eup %864  ;;  %v386_v36 = vmul.f32 0.6931472, %v863_v31  ;;  %v489_v54 = vsub.f32 %v1180_v42, %v487_v40  ;;  %v358_v29 = vrot.slane %v357_v28, 4 }
 0x156   : > { %870 = vlog2.f32 %v480_v32  ;;  %v867_v39 = vpop.eup %866  ;;  %v392_v41 = vmul.f32 %v865_v33, %v1203_v58  ;;  %v495_v62 = vsel %vm335_vm2, %v493_v48, 0.0 }
 0x157   : > { %872 = vrcp.f32 %v480_v32  ;;  %v869_v44 = vpop.eup %868  ;;  %v388_v46 = vsub.f32 %v1184_v45, %v386_v36  ;;  %v435_v47 = vmul.f32 0.6931472, %v867_v39  ;;  %v497_v6 = vmul.f32 %v495_v62, %v489_v54 }
 0x158   : > { %v394_v35 = vsel %vm335_vm2, %v392_v41, 0.0  ;;  %v441_v49 = vmul.f32 %v869_v44, %v1199_v56  ;;  %v359_v30 = vadd.f32 %v358_v29, %v357_v28 }
 0x159   : > { %v437_v50 = vsub.f32 %v1182_v43, %v435_v47  ;;  %v396_v52 = vmul.f32 %v394_v35, %v388_v46  ;;  %v499_v15 = vsel %vm352_vm0, %v497_v6, 0.0 }
 0x15a   : > { %v443_v58 = vsel %vm335_vm2, %v441_v49, 0.0  ;;  %v360_v31 = vrot.slane %v359_v30, 2 }
 0x15b   : > { %v398_v59 = vsel %vm352_vm0, %v396_v52, 0.0  ;;  %v445_v55 = vmul.f32 %v443_v58, %v437_v50  ;;  %v459_v60 = vadd.f32 %v443_v58, %v394_v35 }
 0x15c   : > { %v871_v45 = vpop.eup %870  ;;  %v399_v43 = vadd.f32 %v398_v59, %v397_v57  ;;  %v361_v32 = vadd.f32 %v360_v31, %v359_v30 }
 0x15d   : > { %v873_v56 = vpop.eup %872  ;;  %v485_v63 = vmul.f32 0.6931472, %v871_v45  ;;  %v447_v42 = vsel %vm352_vm0, %v445_v55, 0.0  ;;  %v511_v2 = vadd.f32 %v495_v62, %v459_v60 }
 0x15e   : > { %v492_v1 = vmul.f32 %v873_v56, %v1209_v61  ;;  %400 = vadd.xlane.f32.xlu1 %v399_v43  ;;  %v448_v4 = vadd.f32 %v447_v42, %v446_v0  ;;  %v362_v33 = vrot.slane %v361_v32, 1 }
 0x15f   : > { %v488_v3 = vsub.f32 %v1191_v51, %v485_v63  ;;  %v514_v7 = vmul.f32 0.33333334, %v511_v2 }
 0x160   : > { %v494_v17 = vsel %vm334_vm1, %v492_v1, 0.0  ;;  %449 = vadd.xlane.f32.xlu2 %v448_v4  ;;  %v363_v34 = vadd.f32 %v362_v33, %v361_v32  ;;  %v539_v1 = vand.u32 127, %v328_v9 }
 0x161   : > { %v496_v8 = vmul.f32 %v494_v17, %v488_v3  ;;  %v510_v10 = vadd.f32 %v494_v17, %v458_v5  ;;  %v516_v13 = vmax.f32 %v514_v7, 1e-07 }
 0x162   : > { %725 = vpush %v363_v34  ;;  %vm543_vm4 = vcmp.eq.s32.totalorder %v539_v1, 1  ;;  %vm541_vm5 = vcmp.eq.s32.totalorder %v539_v1, 0 }
 0x163   : > { %v498_v14 = vsel %vm352_vm0, %v496_v8, 0.0  ;;  %v513_v61 = vmul.f32 0.33333334, %v510_v10  ;;  %v518_v18 = vmin.f32 %v516_v13, 1.0  ;;  %vm544_vm6 = vmand %vm540_vm3, %vm543_vm4 }
 0x164   : > { %v500_v16 = vadd.f32 %v499_v15, %v498_v14  ;;  %vm542_vm7 = vmand %vm540_vm3, %vm541_vm5 }
 0x165   : > { %v515_v51 = vmax.f32 %v513_v61, 1e-07  ;;  %874 = vlog2.f32 %v518_v18 }
 0x166   : > { %501 = vadd.xlane.f32.xlu0 %v500_v16 }
 0x167   : > { %v517_v19 = vmin.f32 %v515_v51, 1.0 }
 0x169   : > { %876 = vlog2.f32 %v517_v19 }
 0x16b   : > { %v875_v20 = vpop.eup %874 }
 0x16c   : > { %v522_v12 = vmul.f32 0.6931472, %v875_v20 }
 0x16e   : > { %v524_v23 = vmul.f32 %v522_v12, %v511_v2 }
 0x16f   : > { %v877_v21 = vpop.eup %876 }
 0x170   : > { %v520_v22 = vmul.f32 0.6931472, %v877_v21  ;;  %v526_v26 = vsel %vm352_vm0, %v524_v23, 0.0 }
 0x172   : > { %v523_v24 = vmul.f32 %v520_v22, %v510_v10 }
 0x174   : > { %v525_v25 = vsel %vm352_vm0, %v523_v24, 0.0 }
 0x175   : > { %v527_v27 = vadd.f32 %v526_v26, %v525_v25 }
 0x177   : > { %528 = vadd.xlane.f32.xlu1 %v527_v27 }
 0x193   : > { %s726_s16 = spop %725 }
 0x194   : > { %v547_v2 = vstv %s726_s16 }
 0x1d1   : > { %v401_v36 = vpop.xlane.xlu1 %400 }
 0x1d2   : > { %v402_v38 = vrot.slane %v401_v36, 4 }
 0x1d3   : > { %v450_v39 = vpop.xlane.xlu2 %449 }
 0x1d4   : > { %v403_v40 = vadd.f32 %v402_v38, %v401_v36  ;;  %v451_v41 = vrot.slane %v450_v39, 4 }
 0x1d6   : > { %v404_v37 = vrot.slane %v403_v40, 2  ;;  %v452_v44 = vadd.f32 %v451_v41, %v450_v39 }
 0x1d8   : > { %v453_v46 = vrot.slane %v452_v44, 2  ;;  %v405_v48 = vadd.f32 %v404_v37, %v403_v40 }
 0x1d9   : > { %v502_v47 = vpop.xlane.xlu0 %501 }
 0x1da   : > { %v503_v35 = vrot.slane %v502_v47, 4  ;;  %v454_v49 = vadd.f32 %v453_v46, %v452_v44  ;;  %v406_v50 = vrot.slane %v405_v48, 1 }
 0x1dc   : > { %v504_v52 = vadd.f32 %v503_v35, %v502_v47  ;;  %v407_v53 = vadd.f32 %v406_v50, %v405_v48  ;;  %v455_v54 = vrot.slane %v454_v49, 1 }
 0x1de   : > { %v505_v57 = vrot.slane %v504_v52, 2  ;;  %727 = vpush %v407_v53  ;;  %v456_v58 = vadd.f32 %v455_v54, %v454_v49 }
 0x1e0   : > { %v506_v45 = vadd.f32 %v505_v57, %v504_v52  ;;  %729 = vpush %v456_v58 }
 0x1e2   : > { %v507_v59 = vrot.slane %v506_v45, 1 }
 0x1e4   : > { %v508_v55 = vadd.f32 %v507_v59, %v506_v45 }
 0x1e6   : > { %731 = vpush %v508_v55 }
 0x1ea   : > { %v529_v60 = vpop.xlane.xlu1 %528 }
 0x1eb   : > { %v530_v62 = vrot.slane %v529_v60, 4 }
 0x1ed   : > { %v531_v56 = vadd.f32 %v530_v62, %v529_v60 }
 0x1ef   : > { %v532_v63 = vrot.slane %v531_v56, 2 }
 0x1f1   : > { %v533_v43 = vadd.f32 %v532_v63, %v531_v56 }
 0x1f3   : > { %v534_v0 = vrot.slane %v533_v43, 1 }
 0x1f5   : > { %v535_v42 = vadd.f32 %v534_v0, %v533_v43 }
 0x1f7   : > { %733 = vpush %v535_v42 }
 0x20f   : > { %s728_s17 = spop %727 }
 0x211   : > { %s730_s21 = spop %729 }
 0x212   : > { %s460_s26 = sadd.f32 %s730_s21, %s728_s17 }
 0x217   : > { %s732_s25 = spop %731 }
 0x218   : > { %s512_s30 = sadd.f32 %s732_s25, %s460_s26 }
 0x228   : > { %s734_s3 = spop %733 }
 0x229   : > { %s537_s6 = ssub.f32 %s512_s30, %s734_s3 }
 0x22b   : > { %v545_v9 = vstv %s537_s6 }
 0x22c   : > { %v546_v3 = vsel %vm544_vm6, %v545_v9, 0.0 }
 0x22d   : > { %v548_v11 = vsel %vm542_vm7, %v547_v2, %v546_v3 }
 0x22e   : > { %549 = vst [vmem:[%s307_s4] sm:$0xff] %v548_v11 }
 0x22f   : > { %905 = shalt.err (!%p902_p2)
}
 0x230   : > { %735 = dma.vmem_to_hbm [thread:$0]  (%p1060_p6), %s564_s5, 128, %s566_s7, %s551_s13  }
 0x231 PF: > { %p741_p3 = scmp.ge.s32.totalorder %s972_s12, 2  ;;  %s577_s29 = sand.u32 1, %s960_s9  }
 0x232   : > { %s578_s16 = scalar_lea.sflag [#allocation4], %s577_s29 }
 0x233   : > { %p738_p4 = pnand %p741_p3, %p1064_p8 }
 0x235   : > { %p739_p5 = pneg %p738_p4 }
 0x237   : > { %955 = dma.done.wait (%p739_p5), %s578_s16, 128  }
 0x238   : > { %957 = vsyncadd (%p739_p5), %s578_s16, 4294967168  ;;  %p12_p7 = scmp.ge.s32.totalorder %s1046_s15, 5   ;;  %s1299_s9 = smov %s964_s10 }
 0x239   : > { %s1300_s10 = smov %s968_s11  ;;  %s1301_s11 = smov %s1058_s18 }
 0x23a   : > { %s1302_s12 = smov %s1046_s15  ;;  %14 = sbr.rel (!%p12_p7) target bundleno = 3 (0x3), region = 155 }
 0x23f   :  { %584 = vsyncpa [#allocation4], 1 }
 0x240   :  { %586 = vsyncpa [#allocation4 + $0x1], 1 }

</bundles_post_ra>
